<compile_context>
chip_gen: v7x
topology: tpu7x:2x2x1
jax: 0.10.0
libtpu: 0.0.40
codegen_flags: <defaults>
</compile_context>

<pallas_src>
import jax
import jax.numpy as jnp
from jax import lax
from jax.experimental import pallas as pl
from jax.experimental.pallas import tpu as pltpu

_PAD_LOGIT = -1e30  # zero BCE contribution, sorts last, zero hinge contribution


def _round_up(a, b):
    return -(-a // b) * b


def _bce_margin_kernel(x_ref, y_ref, margin_ref, bce_ref):
    """Hinge margin x*(2y-1) (the sort key) and lane-dense per-tile BCE partial sums."""
    x = x_ref[...]                                   # (TR1, 128) f32
    y = y_ref[...].astype(jnp.float32)               # bf16 -> f32 (labels are 0/1)
    # numerically stable BCE-with-logits: max(x,0) - x*y + log(1 + exp(-|x|))
    bce = jnp.maximum(x, 0.0) - x * y + jnp.log(1.0 + jnp.exp(-jnp.abs(x)))
    margin_ref[...] = x * (2.0 * y - 1.0)
    bce_ref[...] = jnp.sum(bce, axis=0, keepdims=True).reshape(1, 1, 128)


def _lovasz_kernel(off_ref, gts_ref, m_ref, g_ref, out_ref):
    """Lovasz hinge over sorted margins/labels.

    Grid-parallel: the cumulative label count entering this tile (off_ref[t]) and the
    total positive count (gts_ref[0]) come from SMEM scalar prefetch, so there is no
    sequential carry.  O(tile) scans only: a 7-step lane scan + log-step sublane scan.
    """
    t = pl.program_id(0)
    tile_r = m_ref.shape[0]

    gts = gts_ref[0].astype(jnp.float32)
    c_off = off_ref[t].astype(jnp.float32)

    g = g_ref[...].astype(jnp.float32)               # (TR2, 128) labels, sorted order
    col = lax.broadcasted_iota(jnp.int32, (tile_r, 128), 1)
    row = lax.broadcasted_iota(jnp.int32, (tile_r, 128), 0)

    # inclusive cumsum along lanes (per row): 7-step Hillis-Steele scan (VPU + XLU roll).
    cs = g
    for d in (1, 2, 4, 8, 16, 32, 64):
        cs = cs + jnp.where(col >= d, pltpu.roll(cs, shift=d, axis=1), 0.0)

    # exclusive prefix of per-row totals along sublanes; the per-row inclusive total is
    # simply the last lane of cs (no separate lane reduction needed).
    row_tot = jnp.broadcast_to(cs[:, 127:128], (tile_r, 128))
    rc = row_tot
    d = 1
    while d < tile_r:
        rc = rc + jnp.where(row >= d, pltpu.roll(rc, shift=d, axis=0), 0.0)
        d *= 2
    cum_g = cs + (rc - row_tot) + c_off              # global inclusive cumsum (sorted order)

    # 1-based position in the globally sorted order.
    pos = ((t * tile_r + row) * 128 + col + 1).astype(jnp.float32)
    jacc = 1.0 - (gts - cum_g) / (gts + pos - cum_g)

    # lovasz_grad = first difference of jacc along the flattened row-major order.
    jl = pltpu.roll(jacc, shift=1, axis=1)           # previous element within the row
    jlr = pltpu.roll(jl, shift=1, axis=0)            # previous element across row boundary
    prev = jnp.where(col == 0, jlr, jl)
    # closed-form jaccard at the last element of the previous tile (replaces the carry).
    p_prev = (t * (tile_r * 128)).astype(jnp.float32)
    j_prev = jnp.where(t == 0, 0.0, 1.0 - (gts - c_off) / (gts + p_prev - c_off))
    prev = jnp.where((row == 0) & (col == 0), j_prev, prev)

    err = 1.0 - m_ref[...]                           # hinge errors (sorted descending)
    part = jnp.maximum(err, 0.0) * (jacc - prev)
    out_ref[...] = jnp.sum(part, axis=0, keepdims=True).reshape(1, 1, 128)


def bce_lovasz_loss(logits, labels, *, bce_tile_rows=1024, lovasz_tile_rows=128):
    """BCEWithLogitsLoss(mean) + binary Lovasz hinge over the flattened tensor.

    Labels are assumed binary {0, 1} (as required by the Lovasz-hinge formulation).
    """
    # TODO(synk): ignore_index filtering is not implemented (the reference module uses
    # ignore_index=None, which is a no-op).
    n = logits.size
    x = logits.reshape(-1).astype(jnp.float32)
    y = labels.reshape(-1).astype(jnp.float32)

    rows = -(-n // 128)                               # cdiv(n, 128)
    # kernel-2 tile (small: scan-heavy, bounded vreg pressure), multiple of 16 (bf16 tiling)
    tr2 = min(int(lovasz_tile_rows), _round_up(rows, 16))
    tr2 = max(16, _round_up(tr2, 16))
    # kernel-1 tile (large: pure HBM streaming); a whole number of kernel-2 tiles.
    tr1 = min(max(int(bce_tile_rows), tr2), 2048)     # <=2048 keeps default VMEM limits safe
    tr1 = min(tr1, _round_up(rows, tr2))              # don't over-pad tiny inputs
    tr1 = _round_up(tr1, tr2)
    rows_pad = _round_up(rows, tr1)
    n_pad = rows_pad * 128
    nt1 = rows_pad // tr1
    nt2 = rows_pad // tr2

    x_p = jnp.pad(x, (0, n_pad - n), constant_values=_PAD_LOGIT)
    y_p = jnp.pad(y, (0, n_pad - n), constant_values=0.0).astype(jnp.bfloat16)

    # ---- kernel 1: margins + per-tile BCE partial sums (parallel streaming pass) ----
    margin, bce_part = pl.pallas_call(
        _bce_margin_kernel,
        grid=(nt1,),
        in_specs=[
            pl.BlockSpec((tr1, 128), lambda i: (i, 0)),
            pl.BlockSpec((tr1, 128), lambda i: (i, 0)),
        ],
        out_specs=(
            pl.BlockSpec((tr1, 128), lambda i: (i, 0)),
            pl.BlockSpec((1, 1, 128), lambda i: (i, 0, 0)),
        ),
        out_shape=(
            jax.ShapeDtypeStruct((rows_pad, 128), jnp.float32),
            jax.ShapeDtypeStruct((nt1, 1, 128), jnp.float32),
        ),
        compiler_params=pltpu.CompilerParams(dimension_semantics=("parallel",)),
    )(x_p.reshape(rows_pad, 128), y_p.reshape(rows_pad, 128))

    # TODO(synk): there is no clean Pallas/TPU sort primitive; the global sort is a
    # single XLA multi-operand co-sort (keys = margins, payload = labels).
    m_sorted, g_sorted = lax.sort((margin.reshape(-1), y_p), num_keys=1)

    # Per-tile label counts of the sorted labels -> exclusive offsets + total positives.
    # Per-tile counts (< 2^24) are exact in f32; accumulation is done in int32 (exact).
    tile_sums = jnp.sum(
        g_sorted.reshape(nt2, tr2 * 128), axis=1, dtype=jnp.float32
    ).astype(jnp.int32)
    tile_off = jnp.cumsum(tile_sums) - tile_sums      # exclusive cumsum, int32
    gts_arr = jnp.sum(tile_sums).reshape(1)           # total positive count, int32

    # ---- kernel 2: Lovasz hinge (parallel, O(n), scalar offsets via SMEM prefetch) ----
    lovasz_part = pl.pallas_call(
        _lovasz_kernel,
        grid_spec=pltpu.PrefetchScalarGridSpec(
            num_scalar_prefetch=2,
            grid=(nt2,),
            in_specs=[
                pl.BlockSpec((tr2, 128), lambda i, off, gts: (i, 0)),
                pl.BlockSpec((tr2, 128), lambda i, off, gts: (i, 0)),
            ],
            out_specs=pl.BlockSpec((1, 1, 128), lambda i, off, gts: (i, 0, 0)),
        ),
        out_shape=jax.ShapeDtypeStruct((nt2, 1, 128), jnp.float32),
        compiler_params=pltpu.CompilerParams(dimension_semantics=("parallel",)),
    )(tile_off, gts_arr, m_sorted.reshape(rows_pad, 128), g_sorted.reshape(rows_pad, 128))

    bce_mean = jnp.sum(bce_part) / jnp.float32(n)
    return bce_mean + jnp.sum(lovasz_part)


def _reference_loss(logits, labels):
    """Pure-JAX reference (matches the PyTorch BCEWithLogits + Lovasz-hinge forward)."""
    x = logits.reshape(-1).astype(jnp.float32)
    y = labels.reshape(-1).astype(jnp.float32)
    bce = jnp.mean(jnp.maximum(x, 0.0) - x * y + jnp.log1p(jnp.exp(-jnp.abs(x))))
    errors = 1.0 - x * (2.0 * y - 1.0)
    order = jnp.argsort(-errors)
    err_s = errors[order]
    g_s = y[order]
    gts = jnp.sum(g_s)
    cum = jnp.cumsum(g_s)
    inter = gts - cum
    union = gts + jnp.arange(1, x.size + 1, dtype=jnp.float32) - cum
    jacc = 1.0 - inter / union
    grad = jnp.concatenate([jacc[:1], jacc[1:] - jacc[:-1]])
    return bce + jnp.sum(jnp.maximum(err_s, 0.0) * grad)


if __name__ == "__main__":
    key = jax.random.PRNGKey(0)
    k1, k2 = jax.random.split(key)
    # small binary-segmentation shape; 50x50 exercises partial-row padding, and the small
    # tile sizes below exercise the multi-tile paths of both kernels (nt1=2, nt2=4).
    B, C, H, W = 2, 1, 50, 50
    logits = jax.random.normal(k1, (B, C, H, W), dtype=jnp.float32)
    labels = (jax.random.uniform(k2, (B, C, H, W)) > 0.5).astype(jnp.float32)

    loss_fn = jax.jit(
        lambda a, b: bce_lovasz_loss(a, b, bce_tile_rows=32, lovasz_tile_rows=16)
    )
    loss = loss_fn(logits, labels)
    jax.block_until_ready(loss)

    ref = jax.jit(_reference_loss)(logits, labels)
    jax.block_until_ready(ref)

    ok = bool(jnp.isfinite(loss)) and (
        abs(float(loss) - float(ref)) <= 1e-3 * max(1.0, abs(float(ref)))
    )
    if not ok:
        raise AssertionError(f"mismatch: kernel={float(loss):.6f} reference={float(ref):.6f}")
    print("KERNEL_OK")
</pallas_src>

<mosaic_0001>
module attributes {stable_mosaic.version = 11 : i64} {
  func.func @_bce_margin_kernel(%arg0: i32, %arg1: memref<32x128xf32, #tpu.memory_space<vmem>>, %arg2: memref<32x128xbf16, #tpu.memory_space<vmem>>, %arg3: memref<32x128xf32, #tpu.memory_space<vmem>>, %arg4: memref<1x1x128xf32, #tpu.memory_space<vmem>>) attributes {dimension_semantics = [#tpu.dimension_semantics<parallel>], iteration_bounds = array<i64: 2>, scalar_prefetch = 0 : i64, scratch_operands = 0 : i64, tpu.core_type = #tpu.core_type<tc>, window_params = [{transform_indices = @transform_0, window_bounds = array<i64: 32, 128>}, {transform_indices = @transform_1, window_bounds = array<i64: 32, 128>}, {transform_indices = @transform_2, window_bounds = array<i64: 32, 128>}, {transform_indices = @transform_3, window_bounds = array<i64: 1, 1, 128>}]} {
    %c0 = arith.constant 0 : index
    %c0_0 = arith.constant 0 : index
    %0 = vector.load %arg1[%c0, %c0_0] : memref<32x128xf32, #tpu.memory_space<vmem>>, vector<32x128xf32>
    %c0_1 = arith.constant 0 : index
    %c0_2 = arith.constant 0 : index
    %1 = vector.load %arg2[%c0_1, %c0_2] : memref<32x128xbf16, #tpu.memory_space<vmem>>, vector<32x128xbf16>
    %2 = arith.extf %1 : vector<32x128xbf16> to vector<32x128xf32>
    %cst = arith.constant 0.000000e+00 : f32
    %3 = vector.broadcast %cst : f32 to vector<32x128xf32>
    %4 = arith.maximumf %0, %3 : vector<32x128xf32>
    %5 = arith.mulf %0, %2 : vector<32x128xf32>
    %6 = arith.subf %4, %5 : vector<32x128xf32>
    %7 = math.absf %0 : vector<32x128xf32>
    %cst_3 = arith.constant 0.000000e+00 : f32
    %8 = vector.broadcast %cst_3 : f32 to vector<32x128xf32>
    %9 = arith.subf %8, %7 : vector<32x128xf32>
    %10 = math.exp %9 : vector<32x128xf32>
    %cst_4 = arith.constant 1.000000e+00 : f32
    %11 = vector.broadcast %cst_4 : f32 to vector<32x128xf32>
    %12 = arith.addf %11, %10 : vector<32x128xf32>
    %13 = math.log %12 : vector<32x128xf32>
    %14 = arith.addf %6, %13 : vector<32x128xf32>
    %cst_5 = arith.constant 2.000000e+00 : f32
    %15 = vector.broadcast %cst_5 : f32 to vector<32x128xf32>
    %16 = arith.mulf %15, %2 : vector<32x128xf32>
    %cst_6 = arith.constant 1.000000e+00 : f32
    %17 = vector.broadcast %cst_6 : f32 to vector<32x128xf32>
    %18 = arith.subf %16, %17 : vector<32x128xf32>
    %19 = arith.mulf %0, %18 : vector<32x128xf32>
    %c0_7 = arith.constant 0 : index
    %c0_8 = arith.constant 0 : index
    %20 = vector.load %arg3[%c0_7, %c0_8] : memref<32x128xf32, #tpu.memory_space<vmem>>, vector<32x128xf32>
    tpu.vector_store %arg3[%c0_7, %c0_8], %19 {strides = array<i32>} : memref<32x128xf32, #tpu.memory_space<vmem>>, vector<32x128xf32>,
    %cst_9 = arith.constant dense<0.000000e+00> : vector<128xf32>
    %21 = vector.multi_reduction <add>, %14, %cst_9 [0] : vector<32x128xf32> to vector<128xf32>
    %22 = vector.shape_cast %21 : vector<128xf32> to vector<1x128xf32>
    %23 = vector.shape_cast %22 : vector<1x128xf32> to vector<1x1x128xf32>
    %c0_10 = arith.constant 0 : index
    %c0_11 = arith.constant 0 : index
    %c0_12 = arith.constant 0 : index
    %24 = vector.load %arg4[%c0_10, %c0_11, %c0_12] : memref<1x1x128xf32, #tpu.memory_space<vmem>>, vector<1x1x128xf32>
    tpu.vector_store %arg4[%c0_10, %c0_11, %c0_12], %23 {strides = array<i32>} : memref<1x1x128xf32, #tpu.memory_space<vmem>>, vector<1x1x128xf32>,
    return
  }
  func.func @transform_0(%arg0: i32) -> (i32, i32) {
    %c0_i32 = arith.constant 0 : i32
    %c0_i32_0 = arith.constant 0 : i32
    return %arg0, %c0_i32 : i32, i32
  }
  func.func @transform_1(%arg0: i32) -> (i32, i32) {
    %c0_i32 = arith.constant 0 : i32
    %c0_i32_0 = arith.constant 0 : i32
    return %arg0, %c0_i32 : i32, i32
  }
  func.func @transform_2(%arg0: i32) -> (i32, i32) {
    %c0_i32 = arith.constant 0 : i32
    %c0_i32_0 = arith.constant 0 : i32
    return %arg0, %c0_i32 : i32, i32
  }
  func.func @transform_3(%arg0: i32) -> (i32, i32, i32) {
    %c0_i32 = arith.constant 0 : i32
    %c0_i32_0 = arith.constant 0 : i32
    %c0_i32_1 = arith.constant 0 : i32
    return %arg0, %c0_i32, %c0_i32_0 : i32, i32, i32
  }
}

module attributes {stable_mosaic.version = 11 : i64} {
  func.func @_lovasz_kernel(%arg0: i32, %arg1: memref<4xi32, #tpu.memory_space<smem>>, %arg2: memref<1xi32, #tpu.memory_space<smem>>, %arg3: memref<16x128xf32, #tpu.memory_space<vmem>>, %arg4: memref<16x128xbf16, #tpu.memory_space<vmem>>, %arg5: memref<1x1x128xf32, #tpu.memory_space<vmem>>) attributes {dimension_semantics = [#tpu.dimension_semantics<parallel>], iteration_bounds = array<i64: 4>, scalar_prefetch = 2 : i64, scratch_operands = 0 : i64, tpu.core_type = #tpu.core_type<tc>, window_params = [{transform_indices = @transform_0, window_bounds = array<i64: 16, 128>}, {transform_indices = @transform_1, window_bounds = array<i64: 16, 128>}, {transform_indices = @transform_2, window_bounds = array<i64: 1, 1, 128>}]} {
    %c0 = arith.constant 0 : index
    %0 = memref.load %arg2[%c0] : memref<1xi32, #tpu.memory_space<smem>>
    %1 = arith.sitofp %0 : i32 to f32
    %2 = arith.index_cast %arg0 : i32 to index
    %3 = memref.load %arg1[%2] : memref<4xi32, #tpu.memory_space<smem>>
    %4 = arith.sitofp %3 : i32 to f32
    %c0_0 = arith.constant 0 : index
    %c0_1 = arith.constant 0 : index
    %5 = vector.load %arg4[%c0_0, %c0_1] : memref<16x128xbf16, #tpu.memory_space<vmem>>, vector<16x128xbf16>
    %6 = arith.extf %5 : vector<16x128xbf16> to vector<16x128xf32>
    %7 = tpu.iota {dimensions = array<i32: 1>} : vector<16x128xi32>
    %8 = tpu.iota {dimensions = array<i32: 0>} : vector<16x128xi32>
    %c1_i32 = arith.constant 1 : i32
    %9 = vector.broadcast %c1_i32 : i32 to vector<16x128xi32>
    %10 = arith.cmpi sge, %7, %9 : vector<16x128xi32>
    %c1_i32_2 = arith.constant 1 : i32
    %11 = tpu.dynamic_rotate %6 by %c1_i32_2 dim 1 : vector<16x128xf32>, i32 -> vector<16x128xf32>
    %cst = arith.constant 0.000000e+00 : f32
    %12 = vector.broadcast %cst : f32 to vector<16x128xf32>
    %13 = arith.select %10, %11, %12 : vector<16x128xi1>, vector<16x128xf32>
    %14 = arith.addf %6, %13 : vector<16x128xf32>
    %c2_i32 = arith.constant 2 : i32
    %15 = vector.broadcast %c2_i32 : i32 to vector<16x128xi32>
    %16 = arith.cmpi sge, %7, %15 : vector<16x128xi32>
    %c2_i32_3 = arith.constant 2 : i32
    %17 = tpu.dynamic_rotate %14 by %c2_i32_3 dim 1 : vector<16x128xf32>, i32 -> vector<16x128xf32>
    %cst_4 = arith.constant 0.000000e+00 : f32
    %18 = vector.broadcast %cst_4 : f32 to vector<16x128xf32>
    %19 = arith.select %16, %17, %18 : vector<16x128xi1>, vector<16x128xf32>
    %20 = arith.addf %14, %19 : vector<16x128xf32>
    %c4_i32 = arith.constant 4 : i32
    %21 = vector.broadcast %c4_i32 : i32 to vector<16x128xi32>
    %22 = arith.cmpi sge, %7, %21 : vector<16x128xi32>
    %c4_i32_5 = arith.constant 4 : i32
    %23 = tpu.dynamic_rotate %20 by %c4_i32_5 dim 1 : vector<16x128xf32>, i32 -> vector<16x128xf32>
    %cst_6 = arith.constant 0.000000e+00 : f32
    %24 = vector.broadcast %cst_6 : f32 to vector<16x128xf32>
    %25 = arith.select %22, %23, %24 : vector<16x128xi1>, vector<16x128xf32>
    %26 = arith.addf %20, %25 : vector<16x128xf32>
    %c8_i32 = arith.constant 8 : i32
    %27 = vector.broadcast %c8_i32 : i32 to vector<16x128xi32>
    %28 = arith.cmpi sge, %7, %27 : vector<16x128xi32>
    %c8_i32_7 = arith.constant 8 : i32
    %29 = tpu.dynamic_rotate %26 by %c8_i32_7 dim 1 : vector<16x128xf32>, i32 -> vector<16x128xf32>
    %cst_8 = arith.constant 0.000000e+00 : f32
    %30 = vector.broadcast %cst_8 : f32 to vector<16x128xf32>
    %31 = arith.select %28, %29, %30 : vector<16x128xi1>, vector<16x128xf32>
    %32 = arith.addf %26, %31 : vector<16x128xf32>
    %c16_i32 = arith.constant 16 : i32
    %33 = vector.broadcast %c16_i32 : i32 to vector<16x128xi32>
    %34 = arith.cmpi sge, %7, %33 : vector<16x128xi32>
    %c16_i32_9 = arith.constant 16 : i32
    %35 = tpu.dynamic_rotate %32 by %c16_i32_9 dim 1 : vector<16x128xf32>, i32 -> vector<16x128xf32>
    %cst_10 = arith.constant 0.000000e+00 : f32
    %36 = vector.broadcast %cst_10 : f32 to vector<16x128xf32>
    %37 = arith.select %34, %35, %36 : vector<16x128xi1>, vector<16x128xf32>
    %38 = arith.addf %32, %37 : vector<16x128xf32>
    %c32_i32 = arith.constant 32 : i32
    %39 = vector.broadcast %c32_i32 : i32 to vector<16x128xi32>
    %40 = arith.cmpi sge, %7, %39 : vector<16x128xi32>
    %c32_i32_11 = arith.constant 32 : i32
    %41 = tpu.dynamic_rotate %38 by %c32_i32_11 dim 1 : vector<16x128xf32>, i32 -> vector<16x128xf32>
    %cst_12 = arith.constant 0.000000e+00 : f32
    %42 = vector.broadcast %cst_12 : f32 to vector<16x128xf32>
    %43 = arith.select %40, %41, %42 : vector<16x128xi1>, vector<16x128xf32>
    %44 = arith.addf %38, %43 : vector<16x128xf32>
    %c64_i32 = arith.constant 64 : i32
    %45 = vector.broadcast %c64_i32 : i32 to vector<16x128xi32>
    %46 = arith.cmpi sge, %7, %45 : vector<16x128xi32>
    %c64_i32_13 = arith.constant 64 : i32
    %47 = tpu.dynamic_rotate %44 by %c64_i32_13 dim 1 : vector<16x128xf32>, i32 -> vector<16x128xf32>
    %cst_14 = arith.constant 0.000000e+00 : f32
    %48 = vector.broadcast %cst_14 : f32 to vector<16x128xf32>
    %49 = arith.select %46, %47, %48 : vector<16x128xi1>, vector<16x128xf32>
    %50 = arith.addf %44, %49 : vector<16x128xf32>
    %51 = vector.extract_strided_slice %50 {offsets = [0, 127], sizes = [16, 1], strides = [1, 1]} : vector<16x128xf32> to vector<16x1xf32>
    %52 = vector.shape_cast %51 : vector<16x1xf32> to vector<16x1xf32>
    %53 = vector.broadcast %52 : vector<16x1xf32> to vector<16x128xf32>
    %c1_i32_15 = arith.constant 1 : i32
    %54 = vector.broadcast %c1_i32_15 : i32 to vector<16x128xi32>
    %55 = arith.cmpi sge, %8, %54 : vector<16x128xi32>
    %c1_i32_16 = arith.constant 1 : i32
    %56 = tpu.dynamic_rotate %53 by %c1_i32_16 dim 0 : vector<16x128xf32>, i32 -> vector<16x128xf32>
    %cst_17 = arith.constant 0.000000e+00 : f32
    %57 = vector.broadcast %cst_17 : f32 to vector<16x128xf32>
    %58 = arith.select %55, %56, %57 : vector<16x128xi1>, vector<16x128xf32>
    %59 = arith.addf %53, %58 : vector<16x128xf32>
    %c2_i32_18 = arith.constant 2 : i32
    %60 = vector.broadcast %c2_i32_18 : i32 to vector<16x128xi32>
    %61 = arith.cmpi sge, %8, %60 : vector<16x128xi32>
    %c2_i32_19 = arith.constant 2 : i32
    %62 = tpu.dynamic_rotate %59 by %c2_i32_19 dim 0 : vector<16x128xf32>, i32 -> vector<16x128xf32>
    %cst_20 = arith.constant 0.000000e+00 : f32
    %63 = vector.broadcast %cst_20 : f32 to vector<16x128xf32>
    %64 = arith.select %61, %62, %63 : vector<16x128xi1>, vector<16x128xf32>
    %65 = arith.addf %59, %64 : vector<16x128xf32>
    %c4_i32_21 = arith.constant 4 : i32
    %66 = vector.broadcast %c4_i32_21 : i32 to vector<16x128xi32>
    %67 = arith.cmpi sge, %8, %66 : vector<16x128xi32>
    %c4_i32_22 = arith.constant 4 : i32
    %68 = tpu.dynamic_rotate %65 by %c4_i32_22 dim 0 : vector<16x128xf32>, i32 -> vector<16x128xf32>
    %cst_23 = arith.constant 0.000000e+00 : f32
    %69 = vector.broadcast %cst_23 : f32 to vector<16x128xf32>
    %70 = arith.select %67, %68, %69 : vector<16x128xi1>, vector<16x128xf32>
    %71 = arith.addf %65, %70 : vector<16x128xf32>
    %c8_i32_24 = arith.constant 8 : i32
    %72 = vector.broadcast %c8_i32_24 : i32 to vector<16x128xi32>
    %73 = arith.cmpi sge, %8, %72 : vector<16x128xi32>
    %c8_i32_25 = arith.constant 8 : i32
    %74 = tpu.dynamic_rotate %71 by %c8_i32_25 dim 0 : vector<16x128xf32>, i32 -> vector<16x128xf32>
    %cst_26 = arith.constant 0.000000e+00 : f32
    %75 = vector.broadcast %cst_26 : f32 to vector<16x128xf32>
    %76 = arith.select %73, %74, %75 : vector<16x128xi1>, vector<16x128xf32>
    %77 = arith.addf %71, %76 : vector<16x128xf32>
    %78 = arith.subf %77, %53 : vector<16x128xf32>
    %79 = arith.addf %50, %78 : vector<16x128xf32>
    %80 = vector.broadcast %4 : f32 to vector<16x128xf32>
    %81 = arith.addf %79, %80 : vector<16x128xf32>
    %c16_i32_27 = arith.constant 16 : i32
    %82 = arith.muli %arg0, %c16_i32_27 : i32
    %83 = vector.broadcast %82 : i32 to vector<16x128xi32>
    %84 = arith.addi %83, %8 : vector<16x128xi32>
    %c128_i32 = arith.constant 128 : i32
    %85 = vector.broadcast %c128_i32 : i32 to vector<16x128xi32>
    %86 = arith.muli %84, %85 : vector<16x128xi32>
    %87 = arith.addi %86, %7 : vector<16x128xi32>
    %c1_i32_28 = arith.constant 1 : i32
    %88 = vector.broadcast %c1_i32_28 : i32 to vector<16x128xi32>
    %89 = arith.addi %87, %88 : vector<16x128xi32>
    %90 = arith.sitofp %89 : vector<16x128xi32> to vector<16x128xf32>
    %91 = vector.broadcast %1 : f32 to vector<16x128xf32>
    %92 = arith.subf %91, %81 : vector<16x128xf32>
    %93 = vector.broadcast %1 : f32 to vector<16x128xf32>
    %94 = arith.addf %93, %90 : vector<16x128xf32>
    %95 = arith.subf %94, %81 : vector<16x128xf32>
    %96 = arith.divf %92, %95 : vector<16x128xf32>
    %cst_29 = arith.constant 1.000000e+00 : f32
    %97 = vector.broadcast %cst_29 : f32 to vector<16x128xf32>
    %98 = arith.subf %97, %96 : vector<16x128xf32>
    %c1_i32_30 = arith.constant 1 : i32
    %99 = tpu.dynamic_rotate %98 by %c1_i32_30 dim 1 : vector<16x128xf32>, i32 -> vector<16x128xf32>
    %c1_i32_31 = arith.constant 1 : i32
    %100 = tpu.dynamic_rotate %99 by %c1_i32_31 dim 0 : vector<16x128xf32>, i32 -> vector<16x128xf32>
    %c0_i32 = arith.constant 0 : i32
    %101 = vector.broadcast %c0_i32 : i32 to vector<16x128xi32>
    %102 = arith.cmpi eq, %7, %101 : vector<16x128xi32>
    %103 = arith.select %102, %100, %99 : vector<16x128xi1>, vector<16x128xf32>
    %c2048_i32 = arith.constant 2048 : i32
    %104 = arith.muli %arg0, %c2048_i32 : i32
    %105 = arith.sitofp %104 : i32 to f32
    %c0_i32_32 = arith.constant 0 : i32
    %106 = arith.cmpi eq, %arg0, %c0_i32_32 : i32
    %107 = arith.subf %1, %4 : f32
    %108 = arith.addf %1, %105 : f32
    %109 = arith.subf %108, %4 : f32
    %110 = arith.divf %107, %109 : f32
    %cst_33 = arith.constant 1.000000e+00 : f32
    %111 = arith.subf %cst_33, %110 : f32
    %cst_34 = arith.constant 0.000000e+00 : f32
    %112 = arith.select %106, %cst_34, %111 : f32
    %c0_i32_35 = arith.constant 0 : i32
    %113 = vector.broadcast %c0_i32_35 : i32 to vector<16x128xi32>
    %114 = arith.cmpi eq, %8, %113 : vector<16x128xi32>
    %c0_i32_36 = arith.constant 0 : i32
    %115 = vector.broadcast %c0_i32_36 : i32 to vector<16x128xi32>
    %116 = arith.cmpi eq, %7, %115 : vector<16x128xi32>
    %117 = arith.andi %114, %116 : vector<16x128xi1>
    %118 = vector.broadcast %112 : f32 to vector<16x128xf32>
    %119 = arith.select %117, %118, %103 : vector<16x128xi1>, vector<16x128xf32>
    %c0_37 = arith.constant 0 : index
    %c0_38 = arith.constant 0 : index
    %120 = vector.load %arg3[%c0_37, %c0_38] : memref<16x128xf32, #tpu.memory_space<vmem>>, vector<16x128xf32>
    %cst_39 = arith.constant 1.000000e+00 : f32
    %121 = vector.broadcast %cst_39 : f32 to vector<16x128xf32>
    %122 = arith.subf %121, %120 : vector<16x128xf32>
    %cst_40 = arith.constant 0.000000e+00 : f32
    %123 = vector.broadcast %cst_40 : f32 to vector<16x128xf32>
    %124 = arith.maximumf %122, %123 : vector<16x128xf32>
    %125 = arith.subf %98, %119 : vector<16x128xf32>
    %126 = arith.mulf %124, %125 : vector<16x128xf32>
    %cst_41 = arith.constant dense<0.000000e+00> : vector<128xf32>
    %127 = vector.multi_reduction <add>, %126, %cst_41 [0] : vector<16x128xf32> to vector<128xf32>
    %128 = vector.shape_cast %127 : vector<128xf32> to vector<1x128xf32>
    %129 = vector.shape_cast %128 : vector<1x128xf32> to vector<1x1x128xf32>
    %c0_42 = arith.constant 0 : index
    %c0_43 = arith.constant 0 : index
    %c0_44 = arith.constant 0 : index
    %130 = vector.load %arg5[%c0_42, %c0_43, %c0_44] : memref<1x1x128xf32, #tpu.memory_space<vmem>>, vector<1x1x128xf32>
    tpu.vector_store %arg5[%c0_42, %c0_43, %c0_44], %129 {strides = array<i32>} : memref<1x1x128xf32, #tpu.memory_space<vmem>>, vector<1x1x128xf32>,
    return
  }
  func.func @transform_0(%arg0: i32, %arg1: memref<4xi32, #tpu.memory_space<smem>>, %arg2: memref<1xi32, #tpu.memory_space<smem>>) -> (i32, i32) {
    %c0_i32 = arith.constant 0 : i32
    %c0_i32_0 = arith.constant 0 : i32
    return %arg0, %c0_i32 : i32, i32
  }
  func.func @transform_1(%arg0: i32, %arg1: memref<4xi32, #tpu.memory_space<smem>>, %arg2: memref<1xi32, #tpu.memory_space<smem>>) -> (i32, i32) {
    %c0_i32 = arith.constant 0 : i32
    %c0_i32_0 = arith.constant 0 : i32
    return %arg0, %c0_i32 : i32, i32
  }
  func.func @transform_2(%arg0: i32, %arg1: memref<4xi32, #tpu.memory_space<smem>>, %arg2: memref<1xi32, #tpu.memory_space<smem>>) -> (i32, i32, i32) {
    %c0_i32 = arith.constant 0 : i32
    %c0_i32_0 = arith.constant 0 : i32
    %c0_i32_1 = arith.constant 0 : i32
    return %arg0, %c0_i32, %c0_i32_0 : i32, i32, i32
  }
}

</mosaic_0001>

<bundles_post_ra>
// kernel: _lambda_.2
= control target key start
LH: loop header
LB: loop body
LE: loop exit
PB: predicated region body
PF: predicated region fallthrough
CT: control target
= control target key end

     0   :  { %s458_s12 = smov 0   ;;  %s490_s0 = inlined_call_operand.vmem [shape: f32[64,128], index: 0, kind: input, shape index: {}]   ;;  %s491_s1 = inlined_call_operand.vmem [shape: bf16[64,128], index: 1, kind: input, shape index: {}]   ;;  %s492_s2 = inlined_call_operand.vmem [shape: f32[64,128], index: 2, kind: output, shape index: {0}]   ;;  %s493_s3 = inlined_call_operand.vmem [shape: f32[2,1,128], index: 3, kind: output, shape index: {1}]  }
   0x1 LB: > { %s464_s13 = sadd.s32 4294967295, %s436_s12   ;;  %p384_p0 = scmp.ge.s32.totalorder %s436_s12, 1  ;;  %s436_s12 = sphi %s458_s12, %s14_s12  }
   0x2   : > { %p152_p1 = scmp.lt.s32.totalorder %s436_s12, 3 }
   0x4   : > { %p153_p2 = pnand %p384_p0, %p152_p1 }
   0x5   : > { %s385_s14 = sshll.u32 (!%p153_p2), %s464_s13, 2  ;;  %p202_p4 = scmp.lt.s32.totalorder (!%p153_p2), %s464_s13, 1 }
   0x6   : > { %156 = sbr.rel (%p153_p2) target bundleno = 71 (0x47), region = 28  ;;  %p185_p3 = scmp.lt.s32.totalorder (!%p153_p2), %s385_s14, 7 }
   0xd   : > { %s495_s14 = smov (!%p185_p3, %s385_s14), 7  ;;  %s497_s13 = smov (!%p202_p4, %s464_s13), 1 }
   0xe   : > { %s386_s15 = sshll.u32 %s495_s14, 3  ;;  %s388_s16 = sshll.u32 %s495_s14, 2 }
   0xf   : > { %s188_s19 = scalar_lea.vmem %s490_s0, %s386_s15  ;;  %s194_s22 = scalar_lea.vmem %s491_s1, %s388_s16 }
  0x10   : > { %v205_v0 = vld [vmem:[%s188_s19] sm:$0xff]  ;;  %v206_v4 = vld [vmem:[%s188_s19 + $0x8] sm:$0xff]  ;;  %v207_v5 = vld [vmem:[%s188_s19 + $0x10] sm:$0xff]  ;;  %s200_s25 = scalar_lea.vmem %s492_s2, %s386_s15  ;;  %s204_s28 = scalar_lea.vmem %s493_s3, %s497_s13 }
  0x11   : > { %v398_v1 = vld [vmem:[%s194_s22] sm:$0xff]   ;;  %v229_v3 = vand.u32 2147483647, %v205_v0  ;;  %v475_v7 = vld [vmem:[%s194_s22 + $0x8] sm:$0xff]   ;;  %v230_v8 = vand.u32 2147483647, %v206_v4 }
  0x12   : > { %v399_v2 = vunpack.c.l.bf16 %v398_v1  ;;  %v400_v6 = vunpack.c.h.bf16 %v398_v1  ;;  %v231_v13 = vand.u32 2147483647, %v207_v5  ;;  %v403_v16 = vunpack.c.l.bf16 %v475_v7  ;;  %v208_v20 = vld [vmem:[%s188_s19 + $0x18] sm:$0xff] }
  0x13   : > { %v233_v9 = vsub.f32 0.0, %v229_v3  ;;  %v234_v11 = vsub.f32 0.0, %v230_v8  ;;  %v404_v23 = vunpack.c.h.bf16 %v475_v7  ;;  %v232_v27 = vand.u32 2147483647, %v208_v20 }
  0x14   : > { %v261_v10 = vmul.f32 2.0, %v399_v2  ;;  %v262_v12 = vmul.f32 2.0, %v400_v6  ;;  %v235_v19 = vsub.f32 0.0, %v231_v13  ;;  %v263_v22 = vmul.f32 2.0, %v403_v16 }
  0x15   : > { %v237_v14 = vmul.f32 1.442695, %v233_v9  ;;  %v239_v17 = vmul.f32 1.442695, %v234_v11  ;;  %v264_v28 = vmul.f32 2.0, %v404_v23  ;;  %v236_v30 = vsub.f32 0.0, %v232_v27 }
  0x16   : > { %v391_v15 = vadd.f32 -1.0, %v261_v10  ;;  %v392_v18 = vadd.f32 -1.0, %v262_v12  ;;  %v241_v25 = vmul.f32 1.442695, %v235_v19  ;;  %v393_v26 = vadd.f32 -1.0, %v263_v22 }
  0x17   : > { %414 = vpow2.f32 %v237_v14  ;;  %v394_v31 = vadd.f32 -1.0, %v264_v28  ;;  %v243_v32 = vmul.f32 1.442695, %v236_v30  ;;  %v217_v41 = vmax.f32 %v205_v0, 0.0 }
  0x18   : > { %v269_v21 = vmul.f32 %v391_v15, %v205_v0  ;;  %416 = vpow2.f32 %v239_v17  ;;  %v270_v24 = vmul.f32 %v392_v18, %v206_v4  ;;  %v271_v29 = vmul.f32 %v393_v26, %v207_v5 }
  0x19   : > { %418 = vpow2.f32 %v241_v25  ;;  %v272_v33 = vmul.f32 %v394_v31, %v208_v20  ;;  %v221_v42 = vmul.f32 %v399_v2, %v205_v0  ;;  %v218_v43 = vmax.f32 %v206_v4, 0.0 }
  0x1a   : > { %273 = vst [vmem:[%s200_s25] sm:$0xff] %v269_v21  ;;  %274 = vst [vmem:[%s200_s25 + $0x8] sm:$0xff] %v270_v24  ;;  %420 = vpow2.f32 %v243_v32  ;;  %v222_v44 = vmul.f32 %v400_v6, %v206_v4  ;;  %v219_v46 = vmax.f32 %v207_v5, 0.0  ;;  %v223_v47 = vmul.f32 %v403_v16, %v207_v5 }
  0x1b   : > { %275 = vst [vmem:[%s200_s25 + $0x10] sm:$0xff] %v271_v29  ;;  %276 = vst [vmem:[%s200_s25 + $0x18] sm:$0xff] %v272_v33  ;;  %v225_v48 = vsub.f32 %v217_v41, %v221_v42  ;;  %v220_v57 = vmax.f32 %v208_v20, 0.0  ;;  %v224_v58 = vmul.f32 %v404_v23, %v208_v20 }
  0x1c   : > { %v226_v50 = vsub.f32 %v218_v43, %v222_v44  ;;  %v227_v53 = vsub.f32 %v219_v46, %v223_v47 }
  0x1d   : > { %v228_v63 = vsub.f32 %v220_v57, %v224_v58 }
  0x21   : > { %v415_v34 = vpop.eup %414 }
  0x22   : > { %v417_v35 = vpop.eup %416  ;;  %v245_v36 = vadd.f32 1.0, %v415_v34 }
  0x23   : > { %v246_v37 = vadd.f32 1.0, %v417_v35  ;;  %v419_v38 = vpop.eup %418 }
  0x24   : > { %422 = vlog2.f32 %v245_v36  ;;  %v247_v39 = vadd.f32 1.0, %v419_v38  ;;  %v421_v40 = vpop.eup %420 }
  0x25   : > { %424 = vlog2.f32 %v246_v37  ;;  %v248_v45 = vadd.f32 1.0, %v421_v40 }
  0x26   : > { %426 = vlog2.f32 %v247_v39 }
  0x27   : > { %428 = vlog2.f32 %v248_v45 }
  0x2e   : > { %v423_v49 = vpop.eup %422 }
  0x2f   : > { %v425_v51 = vpop.eup %424  ;;  %v250_v52 = vmul.f32 0.6931472, %v423_v49 }
  0x30   : > { %v252_v54 = vmul.f32 0.6931472, %v425_v51  ;;  %v427_v55 = vpop.eup %426 }
  0x31   : > { %v257_v56 = vadd.f32 %v250_v52, %v225_v48  ;;  %v254_v59 = vmul.f32 0.6931472, %v427_v55  ;;  %v429_v0 = vpop.eup %428 }
  0x32   : > { %v258_v60 = vadd.f32 %v252_v54, %v226_v50  ;;  %v256_v1 = vmul.f32 0.6931472, %v429_v0 }
  0x33   : > { %v259_v61 = vadd.f32 %v254_v59, %v227_v53 }
  0x34   : > { %v277_v62 = vadd.f32 %v258_v60, %v257_v56  ;;  %v260_v3 = vadd.f32 %v256_v1, %v228_v63 }
  0x36   : > { %v278_v2 = vadd.f32 %v277_v62, %v259_v61 }
  0x38   : > { %v279_v4 = vadd.f32 %v278_v2, %v260_v3 }
  0x3a   : > { %v280_v5 = vrot.slane %v279_v4, 4 }
  0x3c   : > { %v281_v6 = vadd.f32 %v280_v5, %v279_v4 }
  0x3e   : > { %v282_v7 = vrot.slane %v281_v6, 2 }
  0x40   : > { %v283_v8 = vadd.f32 %v282_v7, %v281_v6 }
  0x42   : > { %v284_v9 = vrot.slane %v283_v8, 1 }
  0x44   : > { %v285_v10 = vadd.f32 %v284_v9, %v283_v8 }
  0x46   : > { %286 = vst [vmem:[%s204_s28] sm:$0x1] %v285_v10 }
  0x47 PF: > { %s14_s12 = sadd.s32 1, %s436_s12  }
  0x48   : > { %p11_p5 = scmp.ge.s32.totalorder %s14_s12, 4  }
  0x4a   :  { %13 = sbr.rel (!%p11_p5) target bundleno = 1 (0x1), region = 73 }

// kernel: _lambda_.3
= control target key start
LH: loop header
LB: loop body
LE: loop exit
PB: predicated region body
PF: predicated region fallthrough
CT: control target
= control target key end

     0   :  { %s635_s0 = inlined_call_operand.vmem [shape: s32[4], index: 0, kind: input, shape index: {}]   ;;  %s636_s1 = inlined_call_operand.<no memory space> [shape: s32[1], index: 1, kind: input, shape index: {}]   ;;  %s637_s2 = inlined_call_operand.vmem [shape: f32[64,128], index: 2, kind: input, shape index: {}]   ;;  %s638_s3 = inlined_call_operand.vmem [shape: bf16[64,128], index: 3, kind: input, shape index: {}]   ;;  %s639_s4 = inlined_call_operand.vmem [shape: f32[4,1,128], index: 4, kind: output, shape index: {}]  }
   0x1   :  { %s9_s17 = sshll.u32 %s635_s0, 4  ;;  %13 = sst [smem:[#allocation4]] %s636_s1  ;;  %s10_s17 = int_to_ptr.vmem [resolvable:$true] %s9_s17 }
   0x2   :  { %s486_s20 = scalar_lea.vmem %s10_s17, 16  ;;  %p491_p1 = scmp.lt.s32.totalorder %s10_s17, %s10_s17 }
   0x3   :  { %p487_p0 = scmp.ne.s32.totalorder %s10_s17, %s486_s20  ;;  %p492_p2 = scmp.lt.s32.totalorder %s486_s20, %s486_s20 }
   0x5   :  { %p493_p3 = por %p492_p2, %p491_p1 }
   0x7   :  { %p494_p4 = pnand %p493_p3, %p487_p0 }
   0x9   :  { %497 = shalt.err (!%p494_p4)  }
   0xa   :  { %s508_s21 = smov [#allocation3]  }
   0xb   :  { %12 = dma.vmem_to_smem %s10_s17, 16, %s508_s21, [#allocation2] }
   0xc   :  { %502 = dma.done.wait [#allocation2], 16 }
   0xd   :  { %503 = vsyncadd [#allocation2], 4294967280 }
   0xe   :  { %15 = sfence }
   0xf   :  { %s548_s22 = smov 0  }
  0x10 LB: > { %s554_s0 = sadd.s32 4294967295, %s506_s22   ;;  %p441_p5 = scmp.ge.s32.totalorder %s506_s22, 1  ;;  %s506_s22 = sphi %s548_s22, %s21_s22  }
  0x11   : > { %p133_p6 = scmp.lt.s32.totalorder %s506_s22, 5 }
  0x13   : > { %p134_p7 = pnand %p441_p5, %p133_p6 }
  0x14   : > { %s442_s1 = sshll.u32 (!%p134_p7), %s554_s0, 1  ;;  %s509_s27 = smov (!%p134_p7), 1   ;;  %v181_v4 = vlaneseq (!%p134_p7)  ;;  %v515_v37 = vmov (!%p134_p7), 127  }
  0x15   : > { %137 = sbr.rel (%p134_p7) target bundleno = 1176 (0x498), region = 28  ;;  %p159_p8 = scmp.lt.s32.totalorder (!%p134_p7), %s442_s1, 7  ;;  %479 = vset.pattern.permute.xlu0 (!%p134_p7), %v515_v37  ;;  %478 = vset.pattern.permute.xlu1 (!%p134_p7), %v515_v37 }
  0x16   : > { %v567_v5 = vand.u32 (!%p134_p7), 127, %v181_v4  ;;  %s510_s28 = smov (!%p134_p7), 2   ;;  %s511_s29 = smov (!%p134_p7), 4   ;;  %v592_v52 = vshrl.u32 (!%p134_p7), %v181_v4, 7 }
  0x17   : > { %s512_s30 = smov (!%p134_p7), 8   ;;  %s513_s5 = smov (!%p134_p7), 16  }
  0x18   : > { %vm186_vm0 = vcmp.ge.s32.totalorder (!%p134_p7), %v567_v5, 1  ;;  %vm195_vm1 = vcmp.ge.s32.totalorder (!%p134_p7), %v567_v5, 2  ;;  %vm204_vm2 = vcmp.ge.s32.totalorder (!%p134_p7), %v567_v5, 4  ;;  %vm213_vm3 = vcmp.ge.s32.totalorder (!%p134_p7), %v567_v5, 8  ;;  %s514_s6 = smov (!%p134_p7), 32   ;;  %s516_s7 = smov (!%p134_p7), 64  }
  0x19   : > { %vm222_vm4 = vcmp.ge.s32.totalorder (!%p134_p7), %v567_v5, 16  ;;  %vm231_vm5 = vcmp.ge.s32.totalorder (!%p134_p7), %v567_v5, 32  ;;  %vm240_vm6 = vcmp.ge.s32.totalorder (!%p134_p7), %v567_v5, 64  ;;  %s173_s8 = sld [smem:[#allocation4]] (!%p134_p7)  ;;  %s447_s10 = sshll.u32 (!%p134_p7), %s554_s0, 11  ;;  %v185_v54 = vadd.s32 (!%p134_p7), 8, %v592_v52 }
  0x1a   : > { %s175_s9 = sld [smem:[#allocation3 + %s554_s0]] (!%p134_p7)  ;;  %s342_s12 = scvt.s32.f32 (!%p134_p7), %s447_s10  ;;  %vm263_vm7 = vcmp.lt.s32.totalorder (!%p134_p7), %v592_v52, 1  ;;  %vm259_vm8 = vcmp.ge.s32.totalorder (!%p134_p7), %v592_v52, 1  ;;  %vm274_vm9 = vcmp.lt.s32.totalorder (!%p134_p7), %v592_v52, 2  ;;  %vm270_vm10 = vcmp.ge.s32.totalorder (!%p134_p7), %v592_v52, 2 }
  0x1b   : > { %s446_s16 = sshll.u32 (!%p134_p7), %s554_s0, 4  ;;  %vm285_vm11 = vcmp.lt.s32.totalorder (!%p134_p7), %v592_v52, 4  ;;  %vm281_vm12 = vcmp.ge.s32.totalorder (!%p134_p7), %v592_v52, 4  ;;  %p343_p9 = scmp.eq.s32.totalorder (!%p134_p7), %s554_s0, 0  ;;  %vm338_vm13 = vcmp.eq.s32.totalorder (!%p134_p7), %v567_v5, 0  ;;  %vm353_vm14 = vcmp.eq.s32.totalorder (!%p134_p7), %v592_v52, 0 }
  0x1c   : > { %s641_s1 = smov (!%p159_p8, %s442_s1), 7  ;;  %v306_v53 = vstv %s446_s16  ;;  %vm355_vm15 = vmand %vm353_vm14, %vm338_vm13  ;;  %p170_p10 = scmp.lt.s32.totalorder %s554_s0, 3 }
  0x1d   : > { %s445_s23 = sshll.u32 %s641_s1, 2  ;;  %v307_v58 = vadd.s32 %v306_v53, %v592_v52  ;;  %v308_v60 = vadd.s32 %v306_v53, %v185_v54  ;;  %s443_s20 = sshll.u32 %s641_s1, 3 }
  0x1e   : > { %s168_s26 = scalar_lea.vmem %s638_s3, %s445_s23  ;;  %s162_s24 = scalar_lea.vmem %s637_s2, %s443_s20 }
  0x1f   : > { %v451_v0 = vld [vmem:[%s168_s26] sm:$0xff]   ;;  %s584_s11 = scvt.s32.f32 %s173_s8  ;;  %v310_v4 = vmul.u32 128, %v308_v60  ;;  %s645_s0 = smov (!%p170_p10, %s554_s0), 3 }
  0x20   : > { %v452_v1 = vunpack.c.l.bf16 %v451_v0  ;;  %v453_v2 = vunpack.c.h.bf16 %v451_v0  ;;  %s586_s13 = scvt.s32.f32 %s175_s9 }
  0x21   : > { %s345_s14 = sadd.f32 %s342_s12, %s584_s11 }
  0x22   : > { %v473_v3 = vpack.i.bf16 %v453_v2, %v452_v1  ;;  %s344_s17 = ssub.f32 %s584_s11, %s586_s13 }
  0x23   : > { %s346_s15 = ssub.f32 %s345_s14, %s586_s13 }
  0x24   : > { %474 = vrot.lane.b32.xlu0 %v473_v3, %s509_s27 }
  0x25   : > { %v347_v50 = vstv %s346_s15 }
  0x26   : > { %480 = vrcp.f32 %v347_v50 }
  0x30   : > { %v481_v51 = vpop.eup %480 }
  0x31   : > { %454 = vpush %v481_v51 }
  0x62   : > { %s455_s18 = spop %454 }
  0x63   : > { %s350_s19 = smul.f32 %s455_s18, %s344_s17 }
  0x65   : > { %s351_s25 = ssub.f32 1.0, %s350_s19 }
  0x67   : > { %s643_s25 = smov (%p343_p9, %s351_s25), 0.0 }
  0x96   : > { %v475_v6 = vpop.permute.xlu0 %474 }
  0x97   : > { %v477_v7 = vunpack.i.h.bf16 %v475_v6  ;;  %v476_v8 = vunpack.i.l.bf16 %v475_v6 }
  0x99   : > { %v192_v9 = vsel %vm186_vm0, %v477_v7, 0.0  ;;  %v191_v10 = vsel %vm186_vm0, %v476_v8, 0.0 }
  0x9a   : > { %v194_v11 = vadd.f32 %v453_v2, %v192_v9  ;;  %v193_v12 = vadd.f32 %v452_v1, %v191_v10  ;;  %v309_v1 = vmul.u32 128, %v307_v58 }
  0x9c   : > { %198 = vrot.lane.b32.xlu1 %v194_v11, %s510_s28  ;;  %196 = vrot.lane.b32.xlu0 %v193_v12, %s510_s28  ;;  %v311_v7 = vadd.s32 %v309_v1, %v567_v5 }
 0x10e   : > { %v199_v13 = vpop.permute.xlu1 %198  ;;  %v197_v14 = vpop.permute.xlu0 %196 }
 0x10f   : > { %v201_v15 = vsel %vm195_vm1, %v199_v13, 0.0  ;;  %v200_v16 = vsel %vm195_vm1, %v197_v14, 0.0 }
 0x110   : > { %v203_v17 = vadd.f32 %v201_v15, %v194_v11  ;;  %v202_v18 = vadd.f32 %v200_v16, %v193_v12  ;;  %v312_v12 = vadd.s32 %v310_v4, %v567_v5  ;;  %v313_v15 = vadd.s32 1, %v311_v7 }
 0x112   : > { %207 = vrot.lane.b32.xlu0 %v203_v17, %s511_s29  ;;  %205 = vrot.lane.b32.xlu1 %v202_v18, %s511_s29 }
 0x184   : > { %v206_v19 = vpop.permute.xlu1 %205  ;;  %v208_v20 = vpop.permute.xlu0 %207 }
 0x185   : > { %v209_v21 = vsel %vm204_vm2, %v206_v19, 0.0  ;;  %v210_v22 = vsel %vm204_vm2, %v208_v20, 0.0 }
 0x186   : > { %v211_v23 = vadd.f32 %v209_v21, %v202_v18  ;;  %v212_v24 = vadd.f32 %v210_v22, %v203_v17  ;;  %v314_v17 = vadd.s32 1, %v312_v12  ;;  %v315_v22 = vcvt.s32.f32 %v313_v15 }
 0x188   : > { %214 = vrot.lane.b32.xlu1 %v211_v23, %s512_s30  ;;  %216 = vrot.lane.b32.xlu0 %v212_v24, %s512_s30 }
 0x1fa   : > { %v215_v25 = vpop.permute.xlu1 %214  ;;  %v217_v26 = vpop.permute.xlu0 %216 }
 0x1fb   : > { %v218_v27 = vsel %vm213_vm3, %v215_v25, 0.0  ;;  %v219_v28 = vsel %vm213_vm3, %v217_v26, 0.0  ;;  %v316_v25 = vcvt.s32.f32 %v314_v17 }
 0x1fc   : > { %v220_v29 = vadd.f32 %v218_v27, %v211_v23  ;;  %v221_v30 = vadd.f32 %v219_v28, %v212_v24  ;;  %v317_v24 = vstv %s584_s11  ;;  %v302_v28 = vstv %s586_s13 }
 0x1fe   : > { %223 = vrot.lane.b32.xlu1 %v220_v29, %s513_s5  ;;  %225 = vrot.lane.b32.xlu0 %v221_v30, %s513_s5 }
 0x270   : > { %v224_v31 = vpop.permute.xlu1 %223  ;;  %v226_v32 = vpop.permute.xlu0 %225 }
 0x271   : > { %v227_v33 = vsel %vm222_vm4, %v224_v31, 0.0  ;;  %v228_v34 = vsel %vm222_vm4, %v226_v32, 0.0  ;;  %v321_v32 = vadd.f32 %v317_v24, %v316_v25 }
 0x272   : > { %v229_v35 = vadd.f32 %v227_v33, %v220_v29  ;;  %v230_v36 = vadd.f32 %v228_v34, %v221_v30  ;;  %v320_v29 = vadd.f32 %v317_v24, %v315_v22 }
 0x274   : > { %232 = vrot.lane.b32.xlu1 %v229_v35, %s514_s6  ;;  %234 = vrot.lane.b32.xlu0 %v230_v36, %s514_s6 }
 0x2e6   : > { %v233_v38 = vpop.permute.xlu1 %232  ;;  %v235_v39 = vpop.permute.xlu0 %234 }
 0x2e7   : > { %v236_v40 = vsel %vm231_vm5, %v233_v38, 0.0  ;;  %v237_v41 = vsel %vm231_vm5, %v235_v39, 0.0 }
 0x2e8   : > { %v238_v42 = vadd.f32 %v236_v40, %v229_v35  ;;  %v239_v43 = vadd.f32 %v237_v41, %v230_v36 }
 0x2ea   : > { %241 = vrot.lane.b32.xlu1 %v238_v42, %s516_s7  ;;  %243 = vrot.lane.b32.xlu0 %v239_v43, %s516_s7 }
 0x35c   : > { %v242_v44 = vpop.permute.xlu1 %241  ;;  %v244_v45 = vpop.permute.xlu0 %243 }
 0x35d   : > { %v245_v46 = vsel %vm240_vm6, %v242_v44, 0.0  ;;  %v246_v47 = vsel %vm240_vm6, %v244_v45, 0.0 }
 0x35e   : > { %v576_v48 = vadd.f32 %v245_v46, %v238_v42  ;;  %v578_v49 = vadd.f32 %v246_v47, %v239_v43  ;;  %v361_v47 = vld [vmem:[%s162_s24 + $0x8] sm:$0xff] }
 0x360   : > { %251 = vperm.xlu1 %478, %v576_v48   ;;  %256 = vperm.xlu0 %479, %v578_v49  }
 0x3df   : > { %v252_v55 = vpop.permute.xlu1 %251  ;;  %v257_v56 = vpop.permute.xlu0 %256 }
 0x3e0   : > { %v261_v57 = vrot.slane %v252_v55, 7  ;;  %v262_v59 = vrot.slane %v257_v56, 7 }
 0x3e2   : > { %v264_v61 = vsel %vm263_vm7, %v261_v57, %v262_v59  ;;  %v265_v62 = vsel %vm263_vm7, %v262_v59, %v261_v57 }
 0x3e3   : > { %v266_v63 = vsel %vm259_vm8, %v265_v62, 0.0  ;;  %v269_v0 = vadd.f32 %v264_v61, %v257_v56 }
 0x3e4   : > { %v268_v2 = vadd.f32 %v266_v63, %v252_v55 }
 0x3e5   : > { %v273_v3 = vrot.slane %v269_v0, 6 }
 0x3e6   : > { %v272_v6 = vrot.slane %v268_v2, 6 }
 0x3e8   : > { %v275_v8 = vsel %vm274_vm9, %v272_v6, %v273_v3  ;;  %v276_v9 = vsel %vm274_vm9, %v273_v3, %v272_v6 }
 0x3e9   : > { %v277_v10 = vsel %vm270_vm10, %v276_v9, 0.0  ;;  %v280_v11 = vadd.f32 %v275_v8, %v269_v0 }
 0x3ea   : > { %v279_v13 = vadd.f32 %v277_v10, %v268_v2 }
 0x3eb   : > { %v284_v14 = vrot.slane %v280_v11, 4 }
 0x3ec   : > { %v283_v16 = vrot.slane %v279_v13, 4 }
 0x3ee   : > { %v286_v18 = vsel %vm285_vm11, %v283_v16, %v284_v14  ;;  %v287_v19 = vsel %vm285_vm11, %v284_v14, %v283_v16 }
 0x3ef   : > { %v288_v20 = vsel %vm281_vm12, %v287_v19, 0.0  ;;  %v291_v21 = vadd.f32 %v286_v18, %v280_v11 }
 0x3f0   : > { %v290_v23 = vadd.f32 %v288_v20, %v279_v13 }
 0x3f2   : > { %v297_v26 = vadd.f32 %v291_v21, %v290_v23  ;;  %v298_v27 = vsub.f32 %v290_v23, %v252_v55  ;;  %v357_v55 = vstv %s643_s25 }
 0x3f4   : > { %v299_v30 = vsub.f32 %v297_v26, %v257_v56  ;;  %v300_v31 = vadd.f32 %v298_v27, %v576_v48  ;;  %v360_v48 = vld [vmem:[%s162_s24] sm:$0xff] }
 0x3f5   : > { %v362_v51 = vsub.f32 1.0, %v360_v48 }
 0x3f6   : > { %v301_v33 = vadd.f32 %v299_v30, %v578_v49  ;;  %v303_v34 = vadd.f32 %v302_v28, %v300_v31  ;;  %v363_v49 = vsub.f32 1.0, %v361_v47 }
 0x3f7   : > { %v364_v60 = vmax.f32 %v362_v51, 0.0 }
 0x3f8   : > { %v304_v35 = vadd.f32 %v302_v28, %v301_v33  ;;  %v322_v36 = vsub.f32 %v320_v29, %v303_v34  ;;  %v318_v38 = vsub.f32 %v317_v24, %v303_v34  ;;  %v365_v58 = vmax.f32 %v363_v49, 0.0 }
 0x3fa   : > { %v323_v37 = vsub.f32 %v321_v32, %v304_v35  ;;  %482 = vrcp.f32 %v322_v36  ;;  %v319_v41 = vsub.f32 %v317_v24, %v304_v35 }
 0x3fc   : > { %484 = vrcp.f32 %v323_v37 }
 0x404   : > { %v483_v39 = vpop.eup %482 }
 0x405   : > { %v325_v40 = vmul.f32 %v483_v39, %v318_v38 }
 0x406   : > { %v485_v42 = vpop.eup %484 }
 0x407   : > { %v328_v43 = vsub.f32 1.0, %v325_v40  ;;  %v327_v44 = vmul.f32 %v485_v42, %v319_v41 }
 0x409   : > { %330 = vrot.lane.b32.xlu1 %v328_v43, %s509_s27  ;;  %v329_v45 = vsub.f32 1.0, %v327_v44 }
 0x40d   : > { %332 = vrot.lane.b32.xlu1 %v329_v45, %s509_s27  ;;  %s172_s27 = scalar_lea.vmem %s639_s4, %s645_s0 }
 0x47b   : > { %v331_v46 = vpop.permute.xlu1 %330 }
 0x47c   : > { %v334_v53 = vrot.slane %v331_v46, 7 }
 0x47f   : > { %v333_v50 = vpop.permute.xlu1 %332 }
 0x480   : > { %v335_v54 = vrot.slane %v333_v50, 7 }
 0x482   : > { %v336_v56 = vsel %vm263_vm7, %v334_v53, %v335_v54  ;;  %v337_v57 = vsel %vm263_vm7, %v335_v54, %v334_v53 }
 0x483   : > { %v339_v59 = vsel %vm338_vm13, %v337_v57, %v331_v46  ;;  %v340_v5 = vsel %vm338_vm13, %v336_v56, %v333_v50 }
 0x484   : > { %v358_v61 = vsel %vm355_vm15, %v357_v55, %v339_v59  ;;  %v367_v62 = vsub.f32 %v329_v45, %v340_v5 }
 0x485   : > { %v366_v63 = vsub.f32 %v328_v43, %v358_v61 }
 0x486   : > { %v369_v0 = vmul.f32 %v367_v62, %v365_v58 }
 0x487   : > { %v368_v1 = vmul.f32 %v366_v63, %v364_v60 }
 0x489   : > { %v370_v2 = vadd.f32 %v369_v0, %v368_v1 }
 0x48b   : > { %v371_v3 = vrot.slane %v370_v2, 4 }
 0x48d   : > { %v372_v4 = vadd.f32 %v371_v3, %v370_v2 }
 0x48f   : > { %v373_v6 = vrot.slane %v372_v4, 2 }
 0x491   : > { %v374_v7 = vadd.f32 %v373_v6, %v372_v4 }
 0x493   : > { %v375_v8 = vrot.slane %v374_v7, 1 }
 0x495   : > { %v376_v52 = vadd.f32 %v375_v8, %v374_v7 }
 0x497   : > { %377 = vst [vmem:[%s172_s27] sm:$0x1] %v376_v52 }
 0x498 PF: > { %s21_s22 = sadd.s32 1, %s506_s22  }
 0x499   : > { %p18_p11 = scmp.ge.s32.totalorder %s21_s22, 6  }
 0x49b   :  { %20 = sbr.rel (!%p18_p11) target bundleno = 16 (0x10), region = 61 }

</bundles_post_ra>
